<compile_context>
chip_gen: v5e
topology: v5e:2x2
jax: 0.10.0
libtpu: 0.0.40
codegen_flags: <defaults>
</compile_context>

<pallas_src>
import jax
import jax.numpy as jnp
from jax.experimental import pallas as pl
from jax.experimental.pallas import tpu as pltpu


def _linear_masked_kernel(w_ref, m_ref, x_ref, o_ref):
    # Fused masked matmul for one T-tile:
    #   o = (W * M) @ x_tile      (M,K)@(K,N) on the MXU, mask on the VPU.
    wm = w_ref[...] * m_ref[...]
    o_ref[...] = jnp.dot(
        wm, x_ref[...], preferred_element_type=jnp.float32
    ).astype(o_ref.dtype)


def linear_masked_forward(weights, mask, x, *, tile_t: int = 128):
    """Forward pass of LinearMasked: (weights * mask) @ x.

    Args:
      weights: (n_out, n_in) array.
      mask:    (n_out, n_in) array.
      x:       (n_in,) vector or (n_in, T) batch of column vectors.
      tile_t:  tile size along the T (batch/time) axis; multiple of 128.

    Returns:
      (n_out,) or (n_out, T) array, float32.
    """
    dtype = jnp.float32
    weights = jnp.asarray(weights, dtype)
    mask = jnp.asarray(mask, dtype)
    n_out, n_in = weights.shape

    x = jnp.asarray(x, dtype)
    squeeze = x.ndim == 1
    if squeeze:
        x = x[:, None]
    t = x.shape[1]

    # Pad T up to a multiple of the lane-dense tile so every output store is
    # a full (n_out, tile_t) tile (padded columns are zero and sliced off).
    num_tiles = (t + tile_t - 1) // tile_t
    t_pad = num_tiles * tile_t
    if t_pad != t:
        x = jnp.pad(x, ((0, 0), (0, t_pad - t)))

    out = pl.pallas_call(
        _linear_masked_kernel,
        out_shape=jax.ShapeDtypeStruct((n_out, t_pad), dtype),
        grid=(num_tiles,),
        in_specs=[
            # weights / mask: resident in VMEM across the whole grid.
            pl.BlockSpec((n_out, n_in), lambda j: (0, 0)),
            pl.BlockSpec((n_out, n_in), lambda j: (0, 0)),
            # x: one (n_in, tile_t) column-tile per grid step.
            pl.BlockSpec((n_in, tile_t), lambda j: (0, j)),
        ],
        out_specs=pl.BlockSpec((n_out, tile_t), lambda j: (0, j)),
        compiler_params=pltpu.CompilerParams(
            dimension_semantics=("parallel",)),
    )(weights, mask, x)

    out = out[:, :t]
    if squeeze:
        out = out[:, 0]
    return out


if __name__ == "__main__":
    n_in, n_out, T = 32, 16, 200

    key = jax.random.PRNGKey(0)
    k_w, k_m, k_x, k_v = jax.random.split(key, 4)

    # Deterministic synthetic parameters (module __init__ shapes).
    weights = jax.random.normal(k_w, (n_out, n_in), dtype=jnp.float32)
    mask = (jax.random.uniform(k_m, (n_out, n_in)) > 0.5).astype(jnp.float32)

    # Batched forward: T column vectors fused into one pallas_call.
    x = jax.random.normal(k_x, (n_in, T), dtype=jnp.float32)
    out = jax.block_until_ready(linear_masked_forward(weights, mask, x))
    ref = (weights * mask) @ x
    assert out.shape == (n_out, T)
    assert jnp.allclose(out, ref, atol=1e-4, rtol=1e-4)

    # Single-vector forward, matching the module's typical call signature.
    xv = jax.random.normal(k_v, (n_in,), dtype=jnp.float32)
    outv = jax.block_until_ready(linear_masked_forward(weights, mask, xv))
    refv = (weights * mask) @ xv
    assert outv.shape == (n_out,)
    assert jnp.allclose(outv, refv, atol=1e-4, rtol=1e-4)

    print("KERNEL_OK")
</pallas_src>

<mosaic_0001>
module attributes {stable_mosaic.version = 11 : i64} {
  func.func @_linear_masked_kernel(%arg0: i32, %arg1: memref<16x32xf32, #tpu.memory_space<vmem>>, %arg2: memref<16x32xf32, #tpu.memory_space<vmem>>, %arg3: memref<32x128xf32, #tpu.memory_space<vmem>>, %arg4: memref<16x128xf32, #tpu.memory_space<vmem>>) attributes {dimension_semantics = [#tpu.dimension_semantics<parallel>], iteration_bounds = array<i64: 2>, scalar_prefetch = 0 : i64, scratch_operands = 0 : i64, tpu.core_type = #tpu.core_type<tc>, window_params = [{pipeline_mode = #tpu.pipeline_mode<synchronous>, transform_indices = @transform_0, window_bounds = array<i64: 16, 32>}, {pipeline_mode = #tpu.pipeline_mode<synchronous>, transform_indices = @transform_1, window_bounds = array<i64: 16, 32>}, {transform_indices = @transform_2, window_bounds = array<i64: 32, 128>}, {transform_indices = @transform_3, window_bounds = array<i64: 16, 128>}]} {
    %c0 = arith.constant 0 : index
    %c0_0 = arith.constant 0 : index
    %0 = vector.load %arg1[%c0, %c0_0] : memref<16x32xf32, #tpu.memory_space<vmem>>, vector<16x32xf32>
    %c0_1 = arith.constant 0 : index
    %c0_2 = arith.constant 0 : index
    %1 = vector.load %arg2[%c0_1, %c0_2] : memref<16x32xf32, #tpu.memory_space<vmem>>, vector<16x32xf32>
    %2 = arith.mulf %0, %1 : vector<16x32xf32>
    %c0_3 = arith.constant 0 : index
    %c0_4 = arith.constant 0 : index
    %3 = vector.load %arg3[%c0_3, %c0_4] : memref<32x128xf32, #tpu.memory_space<vmem>>, vector<32x128xf32>
    %cst = arith.constant dense<0.000000e+00> : vector<16x128xf32>
    %4 = tpu.matmul %2, %3, %cst {dimension_numbers = #tpu.dot_dimension_numbers<[1], [0], [0], [1], [0, 0, 1, 1], [], []>} : vector<16x32xf32>, vector<32x128xf32>, vector<16x128xf32> -> vector<16x128xf32>
    %c0_5 = arith.constant 0 : index
    %c0_6 = arith.constant 0 : index
    %5 = vector.load %arg4[%c0_5, %c0_6] : memref<16x128xf32, #tpu.memory_space<vmem>>, vector<16x128xf32>
    tpu.vector_store %arg4[%c0_5, %c0_6], %4 {strides = array<i32>} : memref<16x128xf32, #tpu.memory_space<vmem>>, vector<16x128xf32>,
    return
  }
  func.func @transform_0(%arg0: i32) -> (i32, i32) {
    %c0_i32 = arith.constant 0 : i32
    %c0_i32_0 = arith.constant 0 : i32
    %c0_i32_1 = arith.constant 0 : i32
    return %c0_i32, %c0_i32_0 : i32, i32
  }
  func.func @transform_1(%arg0: i32) -> (i32, i32) {
    %c0_i32 = arith.constant 0 : i32
    %c0_i32_0 = arith.constant 0 : i32
    %c0_i32_1 = arith.constant 0 : i32
    return %c0_i32, %c0_i32_0 : i32, i32
  }
  func.func @transform_2(%arg0: i32) -> (i32, i32) {
    %c0_i32 = arith.constant 0 : i32
    %c0_i32_0 = arith.constant 0 : i32
    return %c0_i32, %arg0 : i32, i32
  }
  func.func @transform_3(%arg0: i32) -> (i32, i32) {
    %c0_i32 = arith.constant 0 : i32
    %c0_i32_0 = arith.constant 0 : i32
    return %c0_i32, %arg0 : i32, i32
  }
}

</mosaic_0001>

<bundles_post_ra>
// kernel: tpu_custom_call.1
= control target key start
LH: loop header
LB: loop body
LE: loop exit
PB: predicated region body
PF: predicated region fallthrough
CT: control target
= control target key end

     0   :  { %s818_s0 = inlined_call_operand.hbm [shape: f32[16,32], index: 0, kind: input, shape index: {}]   ;;  %s819_s1 = inlined_call_operand.hbm [shape: f32[16,32], index: 1, kind: input, shape index: {}]   ;;  %s820_s2 = inlined_call_operand.hbm [shape: f32[32,256], index: 2, kind: input, shape index: {}]   ;;  %s821_s3 = inlined_call_operand.hbm [shape: f32[16,256], index: 3, kind: output, shape index: {}]  }
   0x1   :  { %822 = sst [smem:[#allocation13_spill]] %s818_s0 }
   0x2   :  { %823 = sst [smem:[#allocation14_spill]] %s819_s1 }
   0x3   :  { %8 = vsyncpa [#allocation3], 0 }
   0x4   :  { %9 = vsyncpa [#allocation6], 0 }
   0x5   :  { %10 = vsyncpa [#allocation4], 0 }
   0x6   :  { %12 = vsyncpa [#allocation4 + $0x1], 0  ;;  %s659_s12 = smov 0   ;;  %s661_s13 = smov 0  }
   0x7   :  { %s663_s14 = smov 0   ;;  %s665_s15 = smov 0  }
   0x8 LB: > { %s680_s16 = sadd.s32 4294967295, %s629_s15   ;;  %s370_s17 = sadd.s32 4294967294, %s629_s15   ;;  %s629_s15 = sphi %s665_s15, %s836_s15   ;;  %s625_s14 = sphi %s663_s14, %s835_s14   ;;  %s621_s13 = sphi %s661_s13, %s834_s13   ;;  %s617_s12 = sphi %s659_s12, %s833_s12  }
   0x9   : > { %s684_s18 = sadd.s32 1, %s629_s15   ;;  %s67_s19 = sadd.s32 1, %s625_s14 }
   0xa   : > { %s64_s20 = ssub.s32 %s629_s15, %s684_s18  ;;  %p74_p0 = scmp.ne.s32.totalorder %s625_s14, %s621_s13 }
   0xb   : > { %p65_p1 = scmp.eq.s32.totalorder %s64_s20, 0  ;;  %p75_p2 = scmp.eq.s32.totalorder %s629_s15, 0 }
   0xc   : > { %p80_p3 = scmp.ne.s32.totalorder %s621_s13, %s617_s12  ;;  %p81_p4 = scmp.eq.s32.totalorder %s680_s16, 0 }
   0xd   : > { %s696_s21 = scalar_select %p65_p1, %s625_s14, %s67_s19  }
   0xe   : > { %p698_p5 = por %p75_p2, %p74_p0  ;;  %p704_p6 = por %p81_p4, %p80_p3 }
   0xf   : > { %p104_p7 = scmp.eq.s32.totalorder %s680_s16, 1  ;;  %p110_p8 = scmp.eq.s32.totalorder %s370_s17, 1 }
  0x10   : > { %p371_p9 = scmp.ge.s32.totalorder %s629_s15, 1  ;;  %p117_p10 = scmp.lt.s32.totalorder %s629_s15, 3 }
  0x11   : > { %p711_p11 = por %p104_p7, %p74_p0  ;;  %p715_p12 = por %p110_p8, %p80_p3 }
  0x12   : > { %p719_p13 = pnand %p371_p9, %p117_p10  ;;  %s829_s0 = sld [smem:[#allocation13_spill]] }
  0x13   : > { %s631_s30 = smov [#allocation2]   ;;  %p421_p3 = scmp.lt.s32.totalorder %s629_s15, 2 }
  0x14   : > { %p404_p1 = pneg %p719_p13  ;;  %s130_s4 = sshll.u32 %s631_s30, 4  ;;  %s131_s4 = int_to_ptr.vmem [resolvable:$true] %s130_s4 }
  0x15   : > { %s632_s5 = smov 128   ;;  %s633_s6 = smov 8  }
  0x16   : > { %p405_p0 = pnand %p404_p1, %p81_p4  ;;  %p737_p7 = pnand %p421_p3, %p698_p5 }
  0x17   : > { %s831_s1 = sld [smem:[#allocation14_spill]]  ;;  %s634_s11 = smov [#allocation5]  }
  0x18   : > { %s128_s29 = sshll.u32 %s829_s0, 4  ;;  %s144_s17 = sshll.u32 %s634_s11, 4  ;;  %s129_s29 = int_to_ptr.hbm [resolvable:$true] %s128_s29  ;;  %s145_s17 = int_to_ptr.vmem [resolvable:$true] %s144_s17 }
  0x19   : > { %407 = dma.hbm_to_vmem [thread:$0]  (!%p405_p0), %s129_s29, 256, %s131_s4, [#allocation3], %s632_s5, %s632_s5, %s633_s6  }
  0x1a   : > { %s158_s19 = sand.u32 1, %s629_s15   ;;  %s160_s20 = sand.u32 1, %s625_s14  }
  0x1b   : > { %s375_s22 = sshll.u32 %s160_s20, 5  ;;  %s376_s27 = sshll.u32 %s629_s15, 3 }
  0x1c   : > { %s166_s30 = scalar_lea.hbm %s820_s2, %s376_s27  ;;  %s162_s8 = scalar_lea.vmem [#allocation7], %s375_s22 }
  0x1d   : > { %s142_s10 = sshll.u32 %s831_s1, 4  ;;  %s167_s4 = sshll.u32 %s166_s30, 4  ;;  %s143_s10 = int_to_ptr.hbm [resolvable:$true] %s142_s10  ;;  %s168_s4 = int_to_ptr.hbm [resolvable:$true] %s167_s4 }
  0x1e   : > { %410 = dma.hbm_to_vmem [thread:$0]  (!%p405_p0), %s143_s10, 256, %s145_s17, [#allocation6], %s632_s5, %s632_s5, %s633_s6  }
  0x1f   : > { %s169_s9 = sshll.u32 %s162_s8, 4  ;;  %s159_s11 = scalar_lea.sflag [#allocation3], %s158_s19  ;;  %s170_s9 = int_to_ptr.vmem [resolvable:$true] %s169_s9 }
  0x20   : > { %s525_s0 = sshra.s32 %s168_s4, 4  ;;  %p529_p8 = pneg %p737_p7  ;;  %s526_s0 = int_to_ptr.hbm [resolvable:$true] %s525_s0 }
  0x21   : > { %s527_s1 = scalar_lea.hbm %s526_s0, 32  ;;  %s532_s20 = scalar_lea.hbm %s820_s2, 64 }
  0x22   : > { %p528_p5 = scmp.ne.s32.totalorder %s526_s0, %s527_s1  ;;  %p533_p1 = scmp.lt.s32.totalorder %s526_s0, %s820_s2 }
  0x23   : > { %p534_p0 = scmp.lt.s32.totalorder %s532_s20, %s527_s1 }
  0x24   : > { %p530_p9 = pnand %p529_p8, %p528_p5 }
  0x25   : > { %p535_p3 = por %p534_p0, %p533_p1 }
  0x26   : > { %p531_p10 = pneg %p530_p9 }
  0x28   : > { %p536_p2 = pnand %p535_p3, %p531_p10 }
  0x2a   : > { %539 = shalt.err (!%p536_p2)
}
  0x2b   : > { %s635_s19 = smov 256   ;;  %181 = sbr.rel (%p719_p13) target bundleno = 195 (0xc3), region = 32 }
  0x2c   : > { %414 = dma.hbm_to_vmem [thread:$0]  (!%p737_p7), %s168_s4, 512, %s170_s9, %s159_s11, %s635_s19, %s632_s5, %s633_s6  }
  0x30   : > { %600 = dma.done.wait (%p81_p4), [#allocation3], 256  }
  0x31   : > { %602 = vsyncadd (%p81_p4), [#allocation3], 4294967040 }
  0x32   : > { %604 = dma.done.wait (%p81_p4), [#allocation6], 256  }
  0x33   : > { %606 = vsyncadd (%p81_p4), [#allocation6], 4294967040  ;;  %s193_s0 = sand.u32 1, %s680_s16   ;;  %s777_s1 = sand.u32 1, %s621_s13  }
  0x34   : > { %s380_s26 = sshll.u32 %s777_s1, 5  ;;  %s194_s5 = scalar_lea.sflag [#allocation3], %s193_s0 }
  0x35   : > { %s197_s6 = scalar_lea.vmem [#allocation7], %s380_s26 }
  0x36   : > { %608 = dma.done.wait (%p704_p6), %s194_s5, 512  }
  0x37   : > { %610 = vsyncadd (%p704_p6), %s194_s5, 4294966784  ;;  %v230_v0 = vld [vmem:[%s197_s6 + $0x18] sm:$0xff]  ;;  %v229_v1 = vld [vmem:[%s197_s6 + $0x10] sm:$0xff]  ;;  %vm231_vm0 = vcmask 261120   ;;  %s381_s23 = sshll.u32 %s777_s1, 4  ;;  %s385_s7 = sshll.u32 %s680_s16, 3 }
  0x38   : > { %250 = vmatpush.msra.mxu0 %v230_v0  ;;  %388 = vmatpush.msra.mxu1 %v230_v0  ;;  %v221_v2 = vld [vmem:[#allocation2] sm:$0xff]  ;;  %v223_v3 = vld [vmem:[#allocation5] sm:$0xff]  ;;  %v228_v4 = vld [vmem:[%s197_s6 + $0x8] sm:$0xff]  ;;  %s274_s30 = scalar_lea.hbm %s821_s3, %s385_s7  ;;  %s220_s4 = scalar_lea.vmem [#allocation8], %s381_s23 }
  0x39   : > { %v222_v5 = vld [vmem:[#allocation2 + $0x8] sm:$0xff]  ;;  %v224_v6 = vld [vmem:[#allocation5 + $0x8] sm:$0xff]  ;;  %v227_v7 = vld [vmem:[%s197_s6] sm:$0xff]  ;;  %v225_v8 = vmul.f32 %v223_v3, %v221_v2  ;;  %s275_s8 = sshll.u32 %s220_s4, 4  ;;  %s277_s9 = sshll.u32 %s274_s30, 4  ;;  %s276_s8 = int_to_ptr.vmem [resolvable:$true] %s275_s8  ;;  %s278_s9 = int_to_ptr.hbm [resolvable:$true] %s277_s9 }
  0x3a   : > { %251 = vmatpush.msra.mxu0 %v229_v1  ;;  %389 = vmatpush.msra.mxu1 %v229_v1  ;;  %v226_v9 = vmul.f32 %v224_v6, %v222_v5  ;;  %s264_s11 = scalar_lea.sflag [#allocation4], %s777_s1  ;;  %s569_s10 = sshra.s32 %s278_s9, 4  ;;  %s570_s10 = int_to_ptr.hbm [resolvable:$true] %s569_s10 }
  0x3b   : > { %s571_s17 = scalar_lea.hbm %s570_s10, 16  ;;  %s575_s28 = scalar_lea.hbm %s821_s3, 32 }
  0x3c   : > { %252 = vmatpush.msra.mxu0 %v228_v4  ;;  %390 = vmatpush.msra.mxu1 %v228_v4  ;;  %p572_p4 = scmp.ne.s32.totalorder %s570_s10, %s571_s17  ;;  %p576_p2 = scmp.lt.s32.totalorder %s570_s10, %s821_s3 }
  0x3d   : > { %p577_p7 = scmp.lt.s32.totalorder %s575_s28, %s571_s17 }
  0x3e   : > { %253 = vmatpush.msra.mxu0 %v227_v7  ;;  %391 = vmatpush.msra.mxu1 %v227_v7  ;;  %p573_p6 = pnand %p572_p4, %p711_p11 }
  0x3f   : > { %382 = vmatmul.msk.f32.vlgmr.msra.gmra.mxu0 %vm231_vm0, %v225_v8  ;;  %383 = vmatmul.msk.f32.vlgmr.msra.gmra.mxu1 %vm231_vm0, %v226_v9  ;;  %p578_p5 = por %p577_p7, %p576_p2 }
  0x40   : > { %p574_p13 = pneg %p573_p6 }
  0x42   : > { %p579_p8 = pnand %p578_p5, %p574_p13 }
  0xbc   : > { %v255_v10 = vpop.f32.mrf.mxu0  ;;  %v258_v11 = vpop.f32.mrf.mxu1 }
  0xbd   : > { %261 = vst [vmem:[%s220_s4] sm:$0xff] %v255_v10 }
  0xbe   : > { %262 = vst [vmem:[%s220_s4 + $0x8] sm:$0xff] %v258_v11 }
  0xbf   : > { %582 = shalt.err (!%p579_p8)
}
  0xc0   : > { %s636_s0 = smov 128   ;;  %s637_s1 = smov 256  }
  0xc1   : > { %s638_s26 = smov 8  }
  0xc2   : > { %402 = dma.vmem_to_hbm [thread:$0]  (%p711_p11), %s276_s8, 256, %s278_s9, %s264_s11, %s636_s0, %s637_s1, %s638_s26  }
  0xc3 PF: > { %s292_s5 = sand.u32 1, %s617_s12   ;;  %p832_p9 = scmp.ge.s32.totalorder %s629_s15, 2 }
  0xc4   : > { %s293_s6 = scalar_lea.sflag [#allocation4], %s292_s5 }
  0xc5   : > { %p416_p10 = pnand %p832_p9, %p715_p12 }
  0xc7   : > { %p417_p1 = pneg %p416_p10 }
  0xc9   : > { %612 = dma.done.wait (%p417_p1), %s293_s6, 256  }
  0xca   : > { %614 = vsyncadd (%p417_p1), %s293_s6, 4294967040  ;;  %p15_p0 = scmp.ge.s32.totalorder %s684_s18, 4   ;;  %s833_s12 = smov %s621_s13 }
  0xcb   : > { %s834_s13 = smov %s625_s14  ;;  %s835_s14 = smov %s696_s21 }
  0xcc   : > { %s836_s15 = smov %s684_s18  ;;  %17 = sbr.rel (!%p15_p0) target bundleno = 8 (0x8), region = 84 }
  0xd1   :  { %299 = vsyncpa [#allocation3], 1 }
  0xd2   :  { %301 = vsyncpa [#allocation3 + $0x1], 1 }
  0xd3   :  { %302 = vsyncpa [#allocation6], 1 }
  0xd4   :  { %303 = vsyncpa [#allocation4], 1 }
  0xd5   :  { %305 = vsyncpa [#allocation4 + $0x1], 1 }

</bundles_post_ra>
